<compile_context>
chip_gen: v7x
topology: tpu7x:2x2x1
jax: 0.10.0
libtpu: 0.0.40
codegen_flags: <defaults>
</compile_context>

<pallas_src>
import jax
import jax.numpy as jnp
from jax.experimental import pallas as pl
from jax.experimental.pallas import tpu as pltpu


_LANE = 128
_MAX_BATCH_TILE = 2048  # rows (lanes) per batch tile for training-scale batches


def _round_up(x, m):
    return ((x + m - 1) // m) * m


def _critic_kernel(xT_ref, w1_ref, b1_ref, w2_ref, b2_ref, w3_ref, b3_ref, out_ref):
    """One grid step = one lane-dense batch tile; all critics fused into the matmuls.

    xT_ref : [d_in,        TB]   (batch on lanes)
    w1_ref : [n_c*H1,    d_in]   b1_ref : [n_c*H1, 1]
    w2_ref : [n_c*H2, n_c*H1]    b2_ref : [n_c*H2, 1]   (block-diagonal)
    w3_ref : [n_c,    n_c*H2]    b3_ref : [n_c,    1]   (block-diagonal heads)
    out_ref: [n_c,         TB]
    """
    xT = xT_ref[...]

    h = jnp.dot(w1_ref[...], xT, preferred_element_type=jnp.float32) + b1_ref[...]
    h = jnp.maximum(h, 0.0)                                   # ReLU, [n_c*H1, TB]

    h = jnp.dot(w2_ref[...], h, preferred_element_type=jnp.float32) + b2_ref[...]
    h = jnp.maximum(h, 0.0)                                   # ReLU, [n_c*H2, TB]

    q = jnp.dot(w3_ref[...], h, preferred_element_type=jnp.float32) + b3_ref[...]
    out_ref[...] = q.astype(out_ref.dtype)                    # [n_c, TB], lane-dense


def _merge_params(params):
    """Stack/block-diagonalize per-critic weights so each layer is one matmul."""
    w1, b1, w2, b2, w3, b3 = params
    n_c, h1, d_in = w1.shape
    h2 = w2.shape[1]

    w1_all = w1.reshape(n_c * h1, d_in)                       # [n_c*H1, d_in]
    b1_all = b1.reshape(n_c * h1, 1)

    w2_blk = jnp.zeros((n_c * h2, n_c * h1), dtype=w2.dtype)  # block-diagonal
    w3_blk = jnp.zeros((n_c, n_c * h2), dtype=w3.dtype)       # block-diagonal heads
    for c in range(n_c):                                      # n_c is tiny (static)
        w2_blk = w2_blk.at[c * h2:(c + 1) * h2, c * h1:(c + 1) * h1].set(w2[c])
        w3_blk = w3_blk.at[c, c * h2:(c + 1) * h2].set(w3[c, 0])
    b2_all = b2.reshape(n_c * h2, 1)
    b3_all = b3.reshape(n_c, 1)
    return w1_all, b1_all, w2_blk, b2_all, w3_blk, b3_all


def critic_forward(obs, actions, params):
    """Returns tuple of per-critic Q-values, each [B, 1] (matches Critic.forward)."""
    w1_all, b1_all, w2_blk, b2_all, w3_blk, b3_all = _merge_params(params)
    n_c = w3_blk.shape[0]
    nh1, d_in = w1_all.shape
    nh2 = w2_blk.shape[0]

    B = obs.shape[0]
    assert obs.shape[1] + actions.shape[1] == d_in

    # One-time concat + transpose in the wrapper: batch goes on the lane axis.
    x = jnp.concatenate([obs, actions], axis=1).astype(jnp.float32)   # [B, d_in]

    # Batch tiling: pad to a multiple of 128 (unmasked lane-dense stores);
    # one big tile when small, >=2 tiles for B>=256 (v7x: feeds both TCs),
    # tiles capped at _MAX_BATCH_TILE (amortizes per-step cost on v5e/v6e).
    b_pad0 = _round_up(max(B, 1), _LANE)
    if b_pad0 < 2 * _LANE:
        tb = b_pad0
    else:
        tb = min(_MAX_BATCH_TILE, _round_up(pl.cdiv(b_pad0, 2), _LANE))
    grid_b = pl.cdiv(b_pad0, tb)
    b_pad = grid_b * tb

    if b_pad != B:
        x = jnp.pad(x, ((0, b_pad - B), (0, 0)))
    xT = x.T                                                   # [d_in, b_pad]

    out = pl.pallas_call(
        _critic_kernel,
        out_shape=jax.ShapeDtypeStruct((n_c, b_pad), jnp.float32),
        grid_spec=pl.GridSpec(
            grid=(grid_b,),
            in_specs=[
                pl.BlockSpec((d_in, tb), lambda i: (0, i)),    # xT batch tile
                pl.BlockSpec((nh1, d_in), lambda i: (0, 0)),   # W1 (stacked)   - resident
                pl.BlockSpec((nh1, 1), lambda i: (0, 0)),      # b1             - resident
                pl.BlockSpec((nh2, nh1), lambda i: (0, 0)),    # W2 (block-diag)- resident
                pl.BlockSpec((nh2, 1), lambda i: (0, 0)),      # b2             - resident
                pl.BlockSpec((n_c, nh2), lambda i: (0, 0)),    # W3 (block-diag)- resident
                pl.BlockSpec((n_c, 1), lambda i: (0, 0)),      # b3             - resident
            ],
            out_specs=pl.BlockSpec((n_c, tb), lambda i: (0, i)),   # lane-dense
        ),
        compiler_params=pltpu.CompilerParams(
            dimension_semantics=("parallel",)),   # batch tiles independent (v7x: 2 TCs)
    )(xT, w1_all, b1_all, w2_blk, b2_all, w3_blk, b3_all)

    out = out[:, :B]                                           # drop batch padding
    return tuple(out[c][:, None] for c in range(n_c))          # per-critic [B, 1]


def q1_forward(obs, actions, params):
    """Critic.q1_forward: only the first network's estimate (half the work)."""
    params_q1 = tuple(p[:1] for p in params)                   # slice to critic 0
    return critic_forward(obs, actions, params_q1)[0]


def init_critic_params(key, obs_dim, action_dim, net_arch, n_critics=2):
    """Deterministic synthetic params, torch layout: W [n_c, out, in], b [n_c, out]."""
    d_in = obs_dim + action_dim
    h1, h2 = net_arch
    keys = jax.random.split(key, 6)

    def w(k, fan_in, fan_out):
        lim = 1.0 / jnp.sqrt(fan_in)
        return jax.random.uniform(k, (n_critics, fan_out, fan_in),
                                  minval=-lim, maxval=lim, dtype=jnp.float32)

    def b(k, fan_in, fan_out):
        lim = 1.0 / jnp.sqrt(fan_in)
        return jax.random.uniform(k, (n_critics, fan_out),
                                  minval=-lim, maxval=lim, dtype=jnp.float32)

    return (w(keys[0], d_in, h1), b(keys[1], d_in, h1),
            w(keys[2], h1, h2),   b(keys[3], h1, h2),
            w(keys[4], h2, 1),    b(keys[5], h2, 1))


def _reference_forward(obs, actions, params):
    """Pure-JAX reference of the PyTorch forward, for a sanity check."""
    x = jnp.concatenate([obs, actions], axis=1)
    w1, b1, w2, b2, w3, b3 = params
    outs = []
    for c in range(w1.shape[0]):
        h = jnp.maximum(x @ w1[c].T + b1[c], 0.0)
        h = jnp.maximum(h @ w2[c].T + b2[c], 0.0)
        outs.append(h @ w3[c].T + b3[c])
    return tuple(outs)


if __name__ == "__main__":
    # Small shapes consistent with the module: obs_dim=16, action_dim=16,
    # net_arch=[32, 32], n_critics=2, batch=8.
    obs_dim, action_dim = 16, 16
    net_arch = [32, 32]
    n_critics = 2
    batch = 8

    key = jax.random.PRNGKey(0)
    k_obs, k_act, k_par = jax.random.split(key, 3)
    obs = jax.random.normal(k_obs, (batch, obs_dim), dtype=jnp.float32)
    actions = jax.random.normal(k_act, (batch, action_dim), dtype=jnp.float32)
    params = init_critic_params(k_par, obs_dim, action_dim, net_arch, n_critics)

    q_vals = critic_forward(obs, actions, params)
    q_vals = jax.block_until_ready(q_vals)

    ref = _reference_forward(obs, actions, params)
    for qv, rv in zip(q_vals, ref):
        assert qv.shape == (batch, 1)
        assert jnp.allclose(qv, rv, atol=1e-5, rtol=1e-5)

    # q1_forward path (runs only critic 0).
    q1 = jax.block_until_ready(q1_forward(obs, actions, params))
    assert q1.shape == (batch, 1)
    assert jnp.allclose(q1, ref[0], atol=1e-5, rtol=1e-5)

    print("KERNEL_OK")
</pallas_src>

<mosaic_0001>
module attributes {stable_mosaic.version = 11 : i64} {
  func.func @_critic_kernel(%arg0: i32, %arg1: memref<32x128xf32, #tpu.memory_space<vmem>>, %arg2: memref<64x32xf32, #tpu.memory_space<vmem>>, %arg3: memref<64x1xf32, #tpu.memory_space<vmem>>, %arg4: memref<64x64xf32, #tpu.memory_space<vmem>>, %arg5: memref<64x1xf32, #tpu.memory_space<vmem>>, %arg6: memref<2x64xf32, #tpu.memory_space<vmem>>, %arg7: memref<2x1xf32, #tpu.memory_space<vmem>>, %arg8: memref<2x128xf32, #tpu.memory_space<vmem>>) attributes {dimension_semantics = [#tpu.dimension_semantics<parallel>], iteration_bounds = array<i64: 1>, scalar_prefetch = 0 : i64, scratch_operands = 0 : i64, tpu.core_type = #tpu.core_type<tc>, window_params = [{transform_indices = @transform_0, window_bounds = array<i64: 32, 128>}, {pipeline_mode = #tpu.pipeline_mode<synchronous>, transform_indices = @transform_1, window_bounds = array<i64: 64, 32>}, {pipeline_mode = #tpu.pipeline_mode<synchronous>, transform_indices = @transform_2, window_bounds = array<i64: 64, 1>}, {pipeline_mode = #tpu.pipeline_mode<synchronous>, transform_indices = @transform_3, window_bounds = array<i64: 64, 64>}, {pipeline_mode = #tpu.pipeline_mode<synchronous>, transform_indices = @transform_4, window_bounds = array<i64: 64, 1>}, {pipeline_mode = #tpu.pipeline_mode<synchronous>, transform_indices = @transform_5, window_bounds = array<i64: 2, 64>}, {pipeline_mode = #tpu.pipeline_mode<synchronous>, transform_indices = @transform_6, window_bounds = array<i64: 2, 1>}, {transform_indices = @transform_7, window_bounds = array<i64: 2, 128>}]} {
    %c0 = arith.constant 0 : index
    %c0_0 = arith.constant 0 : index
    %0 = vector.load %arg1[%c0, %c0_0] : memref<32x128xf32, #tpu.memory_space<vmem>>, vector<32x128xf32>
    %c0_1 = arith.constant 0 : index
    %c0_2 = arith.constant 0 : index
    %1 = vector.load %arg2[%c0_1, %c0_2] : memref<64x32xf32, #tpu.memory_space<vmem>>, vector<64x32xf32>
    %cst = arith.constant dense<0.000000e+00> : vector<64x128xf32>
    %2 = tpu.matmul %1, %0, %cst {dimension_numbers = #tpu.dot_dimension_numbers<[1], [0], [0], [1], [0, 0, 1, 1], [], []>} : vector<64x32xf32>, vector<32x128xf32>, vector<64x128xf32> -> vector<64x128xf32>
    %c0_3 = arith.constant 0 : index
    %c0_4 = arith.constant 0 : index
    %3 = vector.load %arg3[%c0_3, %c0_4] : memref<64x1xf32, #tpu.memory_space<vmem>>, vector<64x1xf32>
    %4 = vector.broadcast %3 : vector<64x1xf32> to vector<64x128xf32>
    %5 = arith.addf %2, %4 : vector<64x128xf32>
    %cst_5 = arith.constant 0.000000e+00 : f32
    %6 = vector.broadcast %cst_5 : f32 to vector<64x128xf32>
    %7 = arith.maximumf %5, %6 : vector<64x128xf32>
    %c0_6 = arith.constant 0 : index
    %c0_7 = arith.constant 0 : index
    %8 = vector.load %arg4[%c0_6, %c0_7] : memref<64x64xf32, #tpu.memory_space<vmem>>, vector<64x64xf32>
    %cst_8 = arith.constant dense<0.000000e+00> : vector<64x128xf32>
    %9 = tpu.matmul %8, %7, %cst_8 {dimension_numbers = #tpu.dot_dimension_numbers<[1], [0], [0], [1], [0, 0, 1, 1], [], []>} : vector<64x64xf32>, vector<64x128xf32>, vector<64x128xf32> -> vector<64x128xf32>
    %c0_9 = arith.constant 0 : index
    %c0_10 = arith.constant 0 : index
    %10 = vector.load %arg5[%c0_9, %c0_10] : memref<64x1xf32, #tpu.memory_space<vmem>>, vector<64x1xf32>
    %11 = vector.broadcast %10 : vector<64x1xf32> to vector<64x128xf32>
    %12 = arith.addf %9, %11 : vector<64x128xf32>
    %cst_11 = arith.constant 0.000000e+00 : f32
    %13 = vector.broadcast %cst_11 : f32 to vector<64x128xf32>
    %14 = arith.maximumf %12, %13 : vector<64x128xf32>
    %c0_12 = arith.constant 0 : index
    %c0_13 = arith.constant 0 : index
    %15 = vector.load %arg6[%c0_12, %c0_13] : memref<2x64xf32, #tpu.memory_space<vmem>>, vector<2x64xf32>
    %cst_14 = arith.constant dense<0.000000e+00> : vector<2x128xf32>
    %16 = tpu.matmul %15, %14, %cst_14 {dimension_numbers = #tpu.dot_dimension_numbers<[1], [0], [0], [1], [0, 0, 1, 1], [], []>} : vector<2x64xf32>, vector<64x128xf32>, vector<2x128xf32> -> vector<2x128xf32>
    %c0_15 = arith.constant 0 : index
    %c0_16 = arith.constant 0 : index
    %17 = vector.load %arg7[%c0_15, %c0_16] : memref<2x1xf32, #tpu.memory_space<vmem>>, vector<2x1xf32>
    %18 = vector.broadcast %17 : vector<2x1xf32> to vector<2x128xf32>
    %19 = arith.addf %16, %18 : vector<2x128xf32>
    %c0_17 = arith.constant 0 : index
    %c0_18 = arith.constant 0 : index
    %20 = vector.load %arg8[%c0_17, %c0_18] : memref<2x128xf32, #tpu.memory_space<vmem>>, vector<2x128xf32>
    tpu.vector_store %arg8[%c0_17, %c0_18], %19 {strides = array<i32>} : memref<2x128xf32, #tpu.memory_space<vmem>>, vector<2x128xf32>,
    return
  }
  func.func @transform_0(%arg0: i32) -> (i32, i32) {
    %c0_i32 = arith.constant 0 : i32
    %c0_i32_0 = arith.constant 0 : i32
    return %c0_i32, %arg0 : i32, i32
  }
  func.func @transform_1(%arg0: i32) -> (i32, i32) {
    %c0_i32 = arith.constant 0 : i32
    %c0_i32_0 = arith.constant 0 : i32
    %c0_i32_1 = arith.constant 0 : i32
    return %c0_i32, %c0_i32_0 : i32, i32
  }
  func.func @transform_2(%arg0: i32) -> (i32, i32) {
    %c0_i32 = arith.constant 0 : i32
    %c0_i32_0 = arith.constant 0 : i32
    %c0_i32_1 = arith.constant 0 : i32
    return %c0_i32, %c0_i32_0 : i32, i32
  }
  func.func @transform_3(%arg0: i32) -> (i32, i32) {
    %c0_i32 = arith.constant 0 : i32
    %c0_i32_0 = arith.constant 0 : i32
    %c0_i32_1 = arith.constant 0 : i32
    return %c0_i32, %c0_i32_0 : i32, i32
  }
  func.func @transform_4(%arg0: i32) -> (i32, i32) {
    %c0_i32 = arith.constant 0 : i32
    %c0_i32_0 = arith.constant 0 : i32
    %c0_i32_1 = arith.constant 0 : i32
    return %c0_i32, %c0_i32_0 : i32, i32
  }
  func.func @transform_5(%arg0: i32) -> (i32, i32) {
    %c0_i32 = arith.constant 0 : i32
    %c0_i32_0 = arith.constant 0 : i32
    %c0_i32_1 = arith.constant 0 : i32
    return %c0_i32, %c0_i32_0 : i32, i32
  }
  func.func @transform_6(%arg0: i32) -> (i32, i32) {
    %c0_i32 = arith.constant 0 : i32
    %c0_i32_0 = arith.constant 0 : i32
    %c0_i32_1 = arith.constant 0 : i32
    return %c0_i32, %c0_i32_0 : i32, i32
  }
  func.func @transform_7(%arg0: i32) -> (i32, i32) {
    %c0_i32 = arith.constant 0 : i32
    %c0_i32_0 = arith.constant 0 : i32
    return %c0_i32, %arg0 : i32, i32
  }
}

</mosaic_0001>

<bundles_post_ra>
// kernel: tpu_custom_call.1
= control target key start
LH: loop header
LB: loop body
LE: loop exit
PB: predicated region body
PF: predicated region fallthrough
CT: control target
= control target key end

     0   :  { %vm87_vm0 = vcmask 261120   ;;  %v702_v6 = vmov 0   ;;  %s890_s0 = inlined_call_operand.vmem [shape: f32[32,128], index: 0, kind: input, shape index: {}]   ;;  %s891_s1 = inlined_call_operand.vmem [shape: f32[64,32], index: 1, kind: input, shape index: {}]   ;;  %s892_s2 = inlined_call_operand.vmem [shape: f32[64,1], index: 2, kind: input, shape index: {}]   ;;  %s893_s3 = inlined_call_operand.vmem [shape: f32[64,64], index: 3, kind: input, shape index: {}]   ;;  %s894_s4 = inlined_call_operand.vmem [shape: f32[64,1], index: 4, kind: input, shape index: {}]   ;;  %s895_s5 = inlined_call_operand.vmem [shape: f32[2,64], index: 5, kind: input, shape index: {}]   ;;  %s896_s6 = inlined_call_operand.vmem [shape: f32[2,1], index: 6, kind: input, shape index: {}]   ;;  %s897_s7 = inlined_call_operand.hbm [shape: f32[2,128], index: 7, kind: output, shape index: {}]  }
   0x1   :  { %v27_v0 = vld [vmem:[%s890_s0] sm:$0xff]  ;;  %v28_v1 = vld [vmem:[%s890_s0 + $0x8] sm:$0xff]  ;;  %v29_v2 = vld [vmem:[%s890_s0 + $0x10] sm:$0xff]  ;;  %676 = vset.pattern.permute.xlu0 %v702_v6  ;;  %677 = vset.pattern.permute.xlu1 %v702_v6 }
   0x2   :  { %v635_v3 = vpack.c.bf16 %v28_v1, %v27_v0  ;;  %v30_v4 = vld [vmem:[%s890_s0 + $0x18] sm:$0xff]  ;;  %v31_v5 = vld [vmem:[%s891_s1] sm:$0xff]  ;;  %v41_v9 = vld [vmem:[%s892_s2 + $0x10] sm:$0xff] }
   0x3   :  { %v639_v7 = vpack.c.bf16 %v30_v4, %v29_v2  ;;  %576 = vmatprep.mubr.msk.f32.mxu0 %vm87_vm0, %v31_v5  ;;  %v39_v8 = vld [vmem:[%s892_s2] sm:$0xff]  ;;  %v40_v10 = vld [vmem:[%s892_s2 + $0x8] sm:$0xff]  ;;  %59 = vperm.xlu1 %677, %v41_v9   ;;  %v42_v11 = vld [vmem:[%s892_s2 + $0x18] sm:$0xff] }
   0x4   :  { %636 = vmatprep.subr.bf16.mxu0 %v635_v3  ;;  %49 = vperm.xlu0 %676, %v39_v8   ;;  %v32_v12 = vld [vmem:[%s891_s1 + $0x8] sm:$0xff]  ;;  %v33_v13 = vld [vmem:[%s891_s1 + $0x10] sm:$0xff] }
   0x5   :  { %638 = vmatpush3.bf16.msra.mxu0 %v635_v3 }
   0x6   :  { %640 = vmatprep.subr.bf16.mxu0 %v639_v7 }
   0x8   :  { %54 = vperm.xlu0 %676, %v40_v10  }
   0x9   :  { %642 = vmatpush3.bf16.msra.mxu0 %v639_v7 }
   0xa   :  { %12 = vsyncpa [#allocation3], 0  ;;  %v43_v14 = vld [vmem:[%s892_s2 + $0x20] sm:$0xff]  ;;  %64 = vperm.xlu1 %677, %v42_v11   ;;  %v44_v15 = vld [vmem:[%s892_s2 + $0x28] sm:$0xff]  ;;  %vm281_vm1 = vcmask 523264   ;;  %vm704_vm2 = vmmov 0  }
   0xb   :  { %v34_v16 = vld [vmem:[%s891_s1 + $0x18] sm:$0xff]  ;;  %v35_v17 = vld [vmem:[%s891_s1 + $0x20] sm:$0xff]  ;;  %v45_v18 = vld [vmem:[%s892_s2 + $0x30] sm:$0xff]  ;;  %s706_s22 = smov [#allocation2]  }
   0xc   :  { %577 = vmatmul.mubr.msk.f32.vlgmr.msra.gmra.mrb[0].mxu0 %vm87_vm0, %v32_v12  ;;  %69 = vperm.xlu0 %676, %v43_v14   ;;  %v46_v19 = vld [vmem:[%s892_s2 + $0x38] sm:$0xff]  ;;  %v36_v20 = vld [vmem:[%s891_s1 + $0x28] sm:$0xff]  ;;  %v37_v21 = vld [vmem:[%s891_s1 + $0x30] sm:$0xff]  ;;  %v703_v12 = vmov 0.0|0.0   ;;  %s506_s23 = sshll.u32 %s706_s22, 4  ;;  %s507_s23 = int_to_ptr.vmem [resolvable:$true] %s506_s23 }
   0xd   :  { %579 = vmatprep.mubr.msk.f32.mxu0 %vm87_vm0, %v33_v13  ;;  %v233_v22 = vld [vmem:[%s894_s4] sm:$0xff]  ;;  %v234_v23 = vld [vmem:[%s894_s4 + $0x8] sm:$0xff]  ;;  %v38_v24 = vld [vmem:[%s891_s1 + $0x38] sm:$0xff]  ;;  %659 = vmatprep.subr.bf16.mxu0 %v703_v12  ;;  %v705_v13 = vmov 0.0   ;;  %s678_s24 = scalar_lea.vmem %s507_s23, 32  ;;  %p683_p1 = scmp.lt.s32.totalorder %s507_s23, %s507_s23 }
   0xe   :  { %74 = vperm.xlu1 %677, %v44_v15   ;;  %v235_v25 = vld [vmem:[%s894_s4 + $0x10] sm:$0xff]  ;;  %v236_v26 = vld [vmem:[%s894_s4 + $0x18] sm:$0xff]  ;;  %v237_v27 = vld [vmem:[%s894_s4 + $0x20] sm:$0xff]  ;;  %p679_p0 = scmp.ne.s32.totalorder %s507_s23, %s678_s24  ;;  %p684_p2 = scmp.lt.s32.totalorder %s678_s24, %s678_s24 }
   0xf   :  { %v238_v28 = vld [vmem:[%s894_s4 + $0x28] sm:$0xff]  ;;  %v239_v29 = vld [vmem:[%s894_s4 + $0x30] sm:$0xff]  ;;  %v240_v30 = vld [vmem:[%s894_s4 + $0x38] sm:$0xff] }
  0x10   :  { %580 = vmatmul.mubr.msk.f32.gmra.mrb[2].mxu0 %vm87_vm0, %v34_v16  ;;  %79 = vperm.xlu0 %676, %v45_v18   ;;  %v420_v31 = vld [vmem:[%s896_s6] sm:$0x3]  ;;  %v226_v5 = vld [vmem:[%s893_s3 + $0x8] sm:$0xff]  ;;  %v227_v6 = vld [vmem:[%s893_s3 + $0x10] sm:$0xff]  ;;  %p685_p3 = por %p684_p2, %p683_p1 }
  0x11   :  { %582 = vmatprep.mubr.msk.f32.mxu0 %vm87_vm0, %v35_v17  ;;  %v225_v32 = vld [vmem:[%s893_s3] sm:$0xff]  ;;  %v228_v7 = vld [vmem:[%s893_s3 + $0x18] sm:$0xff]  ;;  %v230_v9 = vld [vmem:[%s893_s3 + $0x28] sm:$0xff] }
  0x12   :  { %84 = vperm.xlu1 %677, %v46_v19   ;;  %604 = vmatprep.mubr.msk.f32.mxu1 %vm281_vm1, %v225_v32  ;;  %v229_v8 = vld [vmem:[%s893_s3 + $0x20] sm:$0xff]  ;;  %v231_v10 = vld [vmem:[%s893_s3 + $0x30] sm:$0xff]  ;;  %v232_v11 = vld [vmem:[%s893_s3 + $0x38] sm:$0xff]  ;;  %p686_p4 = pnand %p685_p3, %p679_p0 }
  0x14   :  { %583 = vmatmul.mubr.msk.f32.gmra.mrb[4].mxu0 %vm87_vm0, %v36_v20  ;;  %243 = vperm.xlu0 %676, %v233_v22  }
  0x15   :  { %585 = vmatprep.mubr.msk.f32.mxu0 %vm87_vm0, %v37_v21 }
  0x16   :  { %248 = vperm.xlu1 %677, %v234_v23  }
  0x18   :  { %586 = vmatmul.mubr.msk.f32.gmra.mrb[6].mxu0 %vm87_vm0, %v38_v24  ;;  %253 = vperm.xlu0 %676, %v235_v25  }
  0x19   :  { %632 = vmatprep.mubr.msk.f32.mxu0 %vm704_vm2, %v705_v13 }
  0x1a   :  { %258 = vperm.xlu1 %677, %v236_v26  }
  0x1c   :  { %263 = vperm.xlu0 %676, %v237_v27  }
  0x1e   :  { %268 = vperm.xlu1 %677, %v238_v28  }
  0x20   :  { %273 = vperm.xlu0 %676, %v239_v29  }
  0x22   :  { %278 = vperm.xlu1 %677, %v240_v30  }
  0x24   :  { %423 = vperm.xlu0 %676, %v420_v31  }
  0x82   :  { %v60_v34 = vpop.permute.xlu1 %59 }
  0x83   :  { %v50_v33 = vpop.permute.xlu0 %49 }
  0x87   :  { %v55_v35 = vpop.permute.xlu0 %54 }
  0x89   :  { %v65_v36 = vpop.permute.xlu1 %64 }
  0x8b   :  { %v70_v49 = vpop.permute.xlu0 %69 }
  0x8d   :  { %v75_v46 = vpop.permute.xlu1 %74 }
  0x8f   :  { %v80_v61 = vpop.permute.xlu0 %79 }
  0x91   :  { %v85_v58 = vpop.permute.xlu1 %84 }
  0x93   :  { %v244_v15 = vpop.permute.xlu0 %243 }
  0x95   :  { %v249_v14 = vpop.permute.xlu1 %248 }
  0x97   :  { %v254_v18 = vpop.permute.xlu0 %253 }
  0x99   :  { %v259_v16 = vpop.permute.xlu1 %258 }
  0x9b   :  { %v264_v30 = vpop.permute.xlu0 %263 }
  0x9d   :  { %v269_v27 = vpop.permute.xlu1 %268 }
  0xdf   :  { %v578_v37 = vpop.f32.mrb[0].mxu0 }
  0xe0   :  { %v184_v38 = vadd.f32 %v578_v37, %v55_v35  ;;  %v178_v39 = vpop.f32.mrb[1].mxu0 }
  0xe1   :  { %v179_v40 = vadd.f32 %v178_v39, %v50_v33  ;;  %v279_v39 = vpop.permute.xlu1 %278 }
  0xe2   :  { %v218_v41 = vmax.f32 %v184_v38, 0.0 }
  0xe3   :  { %v217_v42 = vmax.f32 %v179_v40, 0.0  ;;  %v581_v43 = vpop.f32.mrb[2].mxu0 }
  0xe4   :  { %v194_v44 = vadd.f32 %v581_v43, %v65_v36  ;;  %v188_v45 = vpop.f32.mrb[3].mxu0 }
  0xe5   :  { %v189_v47 = vadd.f32 %v188_v45, %v60_v34  ;;  %v643_v48 = vpack.c.bf16 %v218_v41, %v217_v42  ;;  %v274_v42 = vpop.permute.xlu0 %273 }
  0xe6   :  { %v220_v50 = vmax.f32 %v194_v44, 0.0 }
  0xe7   :  { %v219_v51 = vmax.f32 %v189_v47, 0.0  ;;  %v584_v52 = vpop.f32.mrb[4].mxu0  ;;  %644 = vmatprep.subr.bf16.mxu1 %v643_v48 }
  0xe8   :  { %v204_v53 = vadd.f32 %v584_v52, %v75_v46  ;;  %v198_v54 = vpop.f32.mrb[5].mxu0  ;;  %646 = vmatpush3.bf16.msra.mxu1 %v643_v48 }
  0xe9   :  { %v647_v55 = vpack.c.bf16 %v220_v50, %v219_v51  ;;  %v199_v56 = vadd.f32 %v198_v54, %v70_v49  ;;  %v419_v50 = vld [vmem:[%s895_s5] sm:$0x3]  ;;  %v424_v51 = vpop.permute.xlu0 %423 }
  0xea   :  { %v222_v57 = vmax.f32 %v204_v53, 0.0 }
  0xeb   :  { %v221_v59 = vmax.f32 %v199_v56, 0.0  ;;  %v587_v60 = vpop.f32.mrb[6].mxu0  ;;  %648 = vmatprep.subr.bf16.mxu1 %v647_v55 }
  0xec   :  { %v214_v62 = vadd.f32 %v587_v60, %v85_v58  ;;  %v208_v63 = vpop.f32.mrb[7].mxu0  ;;  %650 = vmatpush3.bf16.msra.mxu1 %v647_v55 }
  0xed   :  { %v651_v0 = vpack.c.bf16 %v222_v57, %v221_v59  ;;  %v209_v1 = vadd.f32 %v208_v63, %v80_v61 }
  0xee   :  { %v224_v2 = vmax.f32 %v214_v62, 0.0 }
  0xef   :  { %v223_v3 = vmax.f32 %v209_v1, 0.0  ;;  %652 = vmatprep.subr.bf16.mxu1 %v651_v0 }
  0xf0   :  { %654 = vmatpush3.bf16.msra.mxu1 %v651_v0 }
  0xf1   :  { %v655_v4 = vpack.c.bf16 %v224_v2, %v223_v3 }
  0xf3   :  { %656 = vmatprep.subr.bf16.mxu1 %v655_v4 }
  0xf4   :  { %658 = vmatpush3.bf16.msra.mxu1 %v655_v4 }
  0xf7   :  { %605 = vmatmul.mubr.msk.f32.vlgmr.msra.gmra.mrb[0].mxu1 %vm281_vm1, %v226_v5 }
  0xf8   :  { %607 = vmatprep.mubr.msk.f32.mxu1 %vm281_vm1, %v227_v6 }
  0xfb   :  { %608 = vmatmul.mubr.msk.f32.gmra.mrb[2].mxu1 %vm281_vm1, %v228_v7 }
  0xfc   :  { %610 = vmatprep.mubr.msk.f32.mxu1 %vm281_vm1, %v229_v8 }
  0xff   :  { %611 = vmatmul.mubr.msk.f32.gmra.mrb[4].mxu1 %vm281_vm1, %v230_v9 }
 0x100   :  { %613 = vmatprep.mubr.msk.f32.mxu1 %vm281_vm1, %v231_v10 }
 0x103   :  { %614 = vmatmul.mubr.msk.f32.gmra.mrb[6].mxu1 %vm281_vm1, %v232_v11 }
 0x1ca   :  { %v606_v17 = vpop.f32.mrb[0].mxu1 }
 0x1cb   :  { %v378_v19 = vadd.f32 %v606_v17, %v249_v14  ;;  %v372_v20 = vpop.f32.mrb[1].mxu1 }
 0x1cc   :  { %v373_v21 = vadd.f32 %v372_v20, %v244_v15 }
 0x1cd   :  { %v412_v22 = vmax.f32 %v378_v19, 0.0 }
 0x1ce   :  { %v411_v23 = vmax.f32 %v373_v21, 0.0  ;;  %v609_v24 = vpop.f32.mrb[2].mxu1 }
 0x1cf   :  { %v388_v25 = vadd.f32 %v609_v24, %v259_v16  ;;  %v382_v26 = vpop.f32.mrb[3].mxu1 }
 0x1d0   :  { %v660_v28 = vpack.c.bf16 %v412_v22, %v411_v23  ;;  %v383_v29 = vadd.f32 %v382_v26, %v254_v18 }
 0x1d1   :  { %v414_v31 = vmax.f32 %v388_v25, 0.0 }
 0x1d2   :  { %v413_v32 = vmax.f32 %v383_v29, 0.0  ;;  %v612_v33 = vpop.f32.mrb[4].mxu1  ;;  %661 = vmatpush3.bf16.msra.mxu0 %v660_v28 }
 0x1d3   :  { %v398_v34 = vadd.f32 %v612_v33, %v269_v27  ;;  %v392_v35 = vpop.f32.mrb[5].mxu1  ;;  %662 = vmatprep.subr.bf16.mxu0 %v703_v12 }
 0x1d4   :  { %v663_v36 = vpack.c.bf16 %v414_v31, %v413_v32  ;;  %v393_v37 = vadd.f32 %v392_v35, %v264_v30 }
 0x1d5   :  { %v416_v38 = vmax.f32 %v398_v34, 0.0 }
 0x1d6   :  { %v415_v40 = vmax.f32 %v393_v37, 0.0  ;;  %v615_v41 = vpop.f32.mrb[6].mxu1  ;;  %664 = vmatpush3.bf16.msra.mxu0 %v663_v36 }
 0x1d7   :  { %v408_v43 = vadd.f32 %v615_v41, %v279_v39  ;;  %v402_v44 = vpop.f32.mrb[7].mxu1  ;;  %665 = vmatprep.subr.bf16.mxu0 %v703_v12 }
 0x1d8   :  { %v666_v45 = vpack.c.bf16 %v416_v38, %v415_v40  ;;  %v403_v46 = vadd.f32 %v402_v44, %v274_v42 }
 0x1d9   :  { %v418_v47 = vmax.f32 %v408_v43, 0.0 }
 0x1da   :  { %v417_v48 = vmax.f32 %v403_v46, 0.0  ;;  %667 = vmatpush3.bf16.msra.mxu0 %v666_v45 }
 0x1db   :  { %668 = vmatprep.subr.bf16.mxu0 %v703_v12 }
 0x1dc   :  { %v669_v49 = vpack.c.bf16 %v418_v47, %v417_v48 }
 0x1de   :  { %670 = vmatpush3.bf16.msra.mxu0 %v669_v49 }
 0x1e1   :  { %633 = vmatmul.mubr.msk.f32.vlgmr.msra.gmra.mrb[8].mxu0 %vm281_vm1, %v419_v50 }
 0x2b4   :  { %v495_v52 = vpop.f32.mrb[8].mxu0 }
 0x2b5   :  { %v496_v53 = vadd.f32 %v495_v52, %v424_v51  ;;  %v634_v54 = vpop.f32.mrb[9].mxu0 }
 0x2b7   :  { %499 = vst [vmem:[#allocation2] sm:$0x3] %v496_v53 }
 0x2b8   :  { %689 = shalt.err (!%p686_p4)
}
 0x2b9   :  { %s690_s5 = scalar_lea.hbm %s897_s7, 32 }
 0x2ba   :  { %p691_p5 = scmp.ne.s32.totalorder %s897_s7, %s690_s5  ;;  %p694_p6 = scmp.lt.u32.totalorder %s690_s5, %s897_s7 }
 0x2bc   :  { %p696_p7 = pnand %p694_p6, %p691_p5 }
 0x2be   :  { %699 = shalt.err (!%p696_p7)
}
 0x2bf   :  { %509 = dma.vmem_to_hbm [thread:$0]  %s507_s23, 32, %s897_s7, [#allocation3]  }
 0x2c0   :  { %700 = dma.done.wait [#allocation3], 32  }
 0x2c1   :  { %701 = vsyncadd [#allocation3], 4294967264 }
 0x2c2   :  { %513 = vsyncpa [#allocation3], 1 }

</bundles_post_ra>
